<compile_context>
chip_gen: v5e
topology: v5e:2x2
jax: 0.10.0
libtpu: 0.0.40
codegen_flags: <defaults>
</compile_context>

<pallas_src>
import functools

import jax
import jax.numpy as jnp
from jax import lax
from jax.experimental import pallas as pl
from jax.experimental.pallas import tpu as pltpu

EPS = 1e-6


def _round_up(x, m):
    return ((x + m - 1) // m) * m


def layernorm_kernel(x_ref, alpha_ref, beta_ref, o_ref, *, d_true):
    # x_ref: (TM, D_pad) tile of rows; alpha/beta are full-width (1, D_pad).
    # Pad columns of x are zero (wrapper pads with zeros), so un-masked sums
    # over D_pad equal sums over the true feature width.
    x = x_ref[...].astype(jnp.float32)

    # --- fused single-sweep statistics ---
    s = jnp.sum(x, axis=-1, keepdims=True)
    ss = jnp.sum(x * x, axis=-1, keepdims=True)

    n = jnp.float32(d_true)
    mean = s * (1.0 / n)
    # Unbiased (ddof=1) variance, torch x.std() semantics.
    var = (ss - n * mean * mean) * (1.0 / (n - 1.0))
    var = jnp.maximum(var, 0.0)  # guard tiny negative from cancellation
    std = lax.sqrt(var)

    # eps added to std (NOT to var) to match the torch module exactly.
    inv = pl.reciprocal(std + EPS, approx=False)

    out = (
        alpha_ref[...].astype(jnp.float32) * (x - mean) * inv
        + beta_ref[...].astype(jnp.float32)
    )
    o_ref[...] = out.astype(o_ref.dtype)


@functools.partial(jax.jit, static_argnames=("tm",))
def layer_normalization(x, alpha, beta, *, tm=256):
    """x: (batch, seq, features); alpha/beta: (features,)."""
    bsz, seq, d = x.shape
    rows = bsz * seq

    # Lane-dense feature width (multiple of 128).
    d_pad = _round_up(d, 128)

    # VMEM-aware sublane-aligned row tile: keep one fp32 tile <= ~4 MiB so
    # double-buffered in/out + fp32 temporaries fit even on v7x (64 MiB VMEM).
    bytes_per_row = d_pad * 4
    tm_cap = max(8, ((4 * 1024 * 1024) // bytes_per_row) // 8 * 8)
    tm_eff = min(tm, tm_cap, _round_up(rows, 8))
    rows_pad = _round_up(rows, tm_eff)

    x2 = x.reshape(rows, d)
    if rows_pad != rows or d_pad != d:
        x2 = jnp.pad(x2, ((0, rows_pad - rows), (0, d_pad - d)))
    alpha2 = alpha.reshape(1, d)
    beta2 = beta.reshape(1, d)
    if d_pad != d:
        alpha2 = jnp.pad(alpha2, ((0, 0), (0, d_pad - d)))
        beta2 = jnp.pad(beta2, ((0, 0), (0, d_pad - d)))

    kernel = functools.partial(layernorm_kernel, d_true=d)

    out = pl.pallas_call(
        kernel,
        out_shape=jax.ShapeDtypeStruct((rows_pad, d_pad), x.dtype),
        grid_spec=pltpu.PrefetchScalarGridSpec(
            num_scalar_prefetch=0,
            grid=(rows_pad // tm_eff,),
            in_specs=[
                pl.BlockSpec((tm_eff, d_pad), lambda i: (i, 0)),  # x row tile
                pl.BlockSpec((1, d_pad), lambda i: (0, 0)),       # alpha
                pl.BlockSpec((1, d_pad), lambda i: (0, 0)),       # bias
            ],
            out_specs=pl.BlockSpec((tm_eff, d_pad), lambda i: (i, 0)),
        ),
        compiler_params=pltpu.CompilerParams(
            dimension_semantics=("parallel",),
            vmem_limit_bytes=64 * 1024 * 1024,
        ),
    )(x2, alpha2, beta2)

    return out[:rows, :d].reshape(bsz, seq, d)


def reference(x, alpha, beta):
    d = x.shape[-1]
    mean = jnp.mean(x, axis=-1, keepdims=True)
    centered = x - mean
    std = jnp.sqrt(jnp.sum(centered * centered, axis=-1, keepdims=True) / (d - 1))
    return alpha * centered / (std + EPS) + beta


if __name__ == "__main__":
    key = jax.random.PRNGKey(0)
    batch, seq, features = 2, 8, 32

    kx, ka, kb = jax.random.split(key, 3)
    x = jax.random.normal(kx, (batch, seq, features), dtype=jnp.float32)

    # Module init: alpha = ones, bias = zeros. Perturb slightly so the affine
    # path is actually exercised.
    alpha = jnp.ones((features,), dtype=jnp.float32) + 0.1 * jax.random.normal(
        ka, (features,), dtype=jnp.float32
    )
    beta = 0.1 * jax.random.normal(kb, (features,), dtype=jnp.float32)

    out = layer_normalization(x, alpha, beta)
    out = jax.block_until_ready(out)

    ref = reference(x, alpha, beta)
    assert out.shape == (batch, seq, features)
    assert jnp.allclose(out, ref, atol=1e-4, rtol=1e-4)
    print("KERNEL_OK")
</pallas_src>

<mosaic_0001>
module attributes {stable_mosaic.version = 11 : i64} {
  func.func @layernorm_kernel(%arg0: i32, %arg1: memref<16x128xf32, #tpu.memory_space<vmem>>, %arg2: memref<1x128xf32, #tpu.memory_space<vmem>>, %arg3: memref<1x128xf32, #tpu.memory_space<vmem>>, %arg4: memref<16x128xf32, #tpu.memory_space<vmem>>) attributes {dimension_semantics = [#tpu.dimension_semantics<parallel>], iteration_bounds = array<i64: 1>, scalar_prefetch = 0 : i64, scratch_operands = 0 : i64, tpu.core_type = #tpu.core_type<tc>, window_params = [{transform_indices = @transform_0, window_bounds = array<i64: 16, 128>}, {pipeline_mode = #tpu.pipeline_mode<synchronous>, transform_indices = @transform_1, window_bounds = array<i64: 1, 128>}, {pipeline_mode = #tpu.pipeline_mode<synchronous>, transform_indices = @transform_2, window_bounds = array<i64: 1, 128>}, {transform_indices = @transform_3, window_bounds = array<i64: 16, 128>}]} {
    %c0 = arith.constant 0 : index
    %c0_0 = arith.constant 0 : index
    %0 = vector.load %arg1[%c0, %c0_0] : memref<16x128xf32, #tpu.memory_space<vmem>>, vector<16x128xf32>
    %cst = arith.constant dense<0.000000e+00> : vector<16xf32>
    %1 = vector.multi_reduction <add>, %0, %cst [1] : vector<16x128xf32> to vector<16xf32>
    %2 = vector.shape_cast %1 : vector<16xf32> to vector<16x1xf32>
    %3 = arith.mulf %0, %0 : vector<16x128xf32>
    %cst_1 = arith.constant dense<0.000000e+00> : vector<16xf32>
    %4 = vector.multi_reduction <add>, %3, %cst_1 [1] : vector<16x128xf32> to vector<16xf32>
    %5 = vector.shape_cast %4 : vector<16xf32> to vector<16x1xf32>
    %cst_2 = arith.constant 1.000000e+00 : f32
    %cst_3 = arith.constant 3.200000e+01 : f32
    %6 = arith.divf %cst_2, %cst_3 : f32
    %7 = vector.broadcast %6 : f32 to vector<16x1xf32>
    %8 = arith.mulf %2, %7 : vector<16x1xf32>
    %cst_4 = arith.constant 3.200000e+01 : f32
    %9 = vector.broadcast %cst_4 : f32 to vector<16x1xf32>
    %10 = arith.mulf %9, %8 : vector<16x1xf32>
    %11 = arith.mulf %10, %8 : vector<16x1xf32>
    %12 = arith.subf %5, %11 : vector<16x1xf32>
    %cst_5 = arith.constant 3.200000e+01 : f32
    %cst_6 = arith.constant 1.000000e+00 : f32
    %13 = arith.subf %cst_5, %cst_6 : f32
    %cst_7 = arith.constant 1.000000e+00 : f32
    %14 = arith.divf %cst_7, %13 : f32
    %15 = vector.broadcast %14 : f32 to vector<16x1xf32>
    %16 = arith.mulf %12, %15 : vector<16x1xf32>
    %cst_8 = arith.constant 0.000000e+00 : f32
    %17 = vector.broadcast %cst_8 : f32 to vector<16x1xf32>
    %18 = arith.maximumf %16, %17 : vector<16x1xf32>
    %19 = math.sqrt %18 : vector<16x1xf32>
    %cst_9 = arith.constant 9.99999997E-7 : f32
    %20 = vector.broadcast %cst_9 : f32 to vector<16x1xf32>
    %21 = arith.addf %19, %20 : vector<16x1xf32>
    %22 = tpu.reciprocal %21 : vector<16x1xf32> -> vector<16x1xf32>
    %c0_10 = arith.constant 0 : index
    %c0_11 = arith.constant 0 : index
    %23 = vector.load %arg2[%c0_10, %c0_11] : memref<1x128xf32, #tpu.memory_space<vmem>>, vector<1x128xf32>
    %24 = vector.broadcast %8 : vector<16x1xf32> to vector<16x128xf32>
    %25 = arith.subf %0, %24 : vector<16x128xf32>
    %26 = vector.broadcast %23 : vector<1x128xf32> to vector<16x128xf32>
    %27 = arith.mulf %26, %25 : vector<16x128xf32>
    %28 = vector.broadcast %22 : vector<16x1xf32> to vector<16x128xf32>
    %29 = arith.mulf %27, %28 : vector<16x128xf32>
    %c0_12 = arith.constant 0 : index
    %c0_13 = arith.constant 0 : index
    %30 = vector.load %arg3[%c0_12, %c0_13] : memref<1x128xf32, #tpu.memory_space<vmem>>, vector<1x128xf32>
    %31 = vector.broadcast %30 : vector<1x128xf32> to vector<16x128xf32>
    %32 = arith.addf %29, %31 : vector<16x128xf32>
    %c0_14 = arith.constant 0 : index
    %c0_15 = arith.constant 0 : index
    %33 = vector.load %arg4[%c0_14, %c0_15] : memref<16x128xf32, #tpu.memory_space<vmem>>, vector<16x128xf32>
    tpu.vector_store %arg4[%c0_14, %c0_15], %32 {strides = array<i32>} : memref<16x128xf32, #tpu.memory_space<vmem>>, vector<16x128xf32>,
    return
  }
  func.func @transform_0(%arg0: i32) -> (i32, i32) {
    %c0_i32 = arith.constant 0 : i32
    %c0_i32_0 = arith.constant 0 : i32
    return %arg0, %c0_i32 : i32, i32
  }
  func.func @transform_1(%arg0: i32) -> (i32, i32) {
    %c0_i32 = arith.constant 0 : i32
    %c0_i32_0 = arith.constant 0 : i32
    %c0_i32_1 = arith.constant 0 : i32
    return %c0_i32, %c0_i32_0 : i32, i32
  }
  func.func @transform_2(%arg0: i32) -> (i32, i32) {
    %c0_i32 = arith.constant 0 : i32
    %c0_i32_0 = arith.constant 0 : i32
    %c0_i32_1 = arith.constant 0 : i32
    return %c0_i32, %c0_i32_0 : i32, i32
  }
  func.func @transform_3(%arg0: i32) -> (i32, i32) {
    %c0_i32 = arith.constant 0 : i32
    %c0_i32_0 = arith.constant 0 : i32
    return %arg0, %c0_i32 : i32, i32
  }
}

</mosaic_0001>

<bundles_post_ra>
// kernel: layer_normalization.1
= control target key start
LH: loop header
LB: loop body
LE: loop exit
PB: predicated region body
PF: predicated region fallthrough
CT: control target
= control target key end

     0   :  { %s179_s0 = inlined_call_operand.vmem [shape: f32[16,128], index: 0, kind: input, shape index: {}]   ;;  %s180_s1 = inlined_call_operand.vmem [shape: f32[1,128], index: 1, kind: input, shape index: {}]   ;;  %s181_s2 = inlined_call_operand.vmem [shape: f32[1,128], index: 2, kind: input, shape index: {}]   ;;  %s182_s3 = inlined_call_operand.vmem [shape: f32[16,128], index: 3, kind: output, shape index: {}]  }
   0x1   :  { %v147_v0 = vld [vmem:[%s179_s0] sm:$0xff]  ;;  %v155_v2 = vld [vmem:[%s179_s0 + $0x8] sm:$0xff] }
   0x2   :  { %16 = vadd.xlane.f32.xlu0 %v147_v0  ;;  %v20_v1 = vmul.f32 %v147_v0, %v147_v0  ;;  %v21_v3 = vmul.f32 %v155_v2, %v155_v2  ;;  %v114_v46 = vld [vmem:[%s180_s1] ss:$0 sm:$0xff] }
   0x3   :  { %v115_v54 = vld [vmem:[%s181_s2] ss:$0 sm:$0xff] }
   0x4   :  { %22 = vadd.xlane.f32.xlu1 %v20_v1 }
   0xa   :  { %18 = vadd.xlane.f32.xlu0 %v155_v2 }
   0xc   :  { %24 = vadd.xlane.f32.xlu1 %v21_v3 }
  0x75   :  { %v17_v4 = vpop.xlane.xlu0 %16 }
  0x76   :  { %v26_v5 = vmul.f32 0.03125, %v17_v4 }
  0x77   :  { %v23_v7 = vpop.xlane.xlu1 %22 }
  0x78   :  { %v28_v6 = vmul.f32 32.0, %v26_v5  ;;  %v93_v47 = vsub.f32 %v147_v0, %v26_v5 }
  0x7a   :  { %v30_v8 = vmul.f32 %v28_v6, %v26_v5  ;;  %v98_v53 = vmul.f32 %v114_v46, %v93_v47 }
  0x7c   :  { %v32_v9 = vsub.f32 %v23_v7, %v30_v8 }
  0x7d   :  { %v19_v10 = vpop.xlane.xlu0 %18 }
  0x7e   :  { %v34_v11 = vmul.f32 0.032258064, %v32_v9  ;;  %v160_v12 = vmul.f32 0.03125, %v19_v10 }
  0x7f   :  { %v25_v15 = vpop.xlane.xlu1 %24 }
  0x80   :  { %v36_v13 = vmax.f32 %v34_v11, 0.0  ;;  %v29_v14 = vmul.f32 32.0, %v160_v12  ;;  %v94_v62 = vsub.f32 %v155_v2, %v160_v12 }
  0x82   :  { %116 = vrsqrt.f32 %v36_v13  ;;  %v31_v16 = vmul.f32 %v29_v14, %v160_v12  ;;  %vm45_vm0 = vcmp.eq.f32.partialorder %v36_v13, inf  ;;  %v48_v29 = vand.u32 2147483648, %v36_v13 }
  0x83   :  { %vm47_vm1 = vcmp.eq.f32.partialorder %v36_v13, 0.0  ;;  %v99_v4 = vmul.f32 %v114_v46, %v94_v62 }
  0x84   :  { %v33_v17 = vsub.f32 %v25_v15, %v31_v16 }
  0x86   :  { %v35_v18 = vmul.f32 0.032258064, %v33_v17 }
  0x88   :  { %v117_v19 = vpop.eup %116  ;;  %v37_v21 = vmax.f32 %v35_v18, 0.0 }
  0x89   :  { %v39_v20 = vmul.f32 %v117_v19, %v36_v13 }
  0x8a   :  { %118 = vrsqrt.f32 %v37_v21  ;;  %vm57_vm2 = vcmp.eq.f32.partialorder %v37_v21, inf  ;;  %v60_v38 = vand.u32 2147483648, %v37_v21  ;;  %vm59_vm3 = vcmp.eq.f32.partialorder %v37_v21, 0.0 }
  0x8b   :  { %v40_v22 = vmul.f32 %v117_v19, %v39_v20 }
  0x8d   :  { %v41_v23 = vmul.f32 0.5, %v40_v22 }
  0x8f   :  { %v42_v24 = vsub.f32 1.5, %v41_v23 }
  0x90   :  { %v119_v25 = vpop.eup %118 }
  0x91   :  { %v43_v26 = vmul.f32 %v117_v19, %v42_v24  ;;  %v51_v27 = vmul.f32 %v119_v25, %v37_v21 }
  0x93   :  { %v44_v28 = vmul.f32 %v43_v26, %v36_v13  ;;  %v52_v30 = vmul.f32 %v119_v25, %v51_v27 }
  0x95   :  { %v46_v31 = vsel %vm45_vm0, %v36_v13, %v44_v28  ;;  %v53_v33 = vmul.f32 0.5, %v52_v30 }
  0x96   :  { %v49_v32 = vsel %vm47_vm1, %v48_v29, %v46_v31 }
  0x97   :  { %v62_v34 = vadd.f32 1e-06, %v49_v32  ;;  %v54_v35 = vsub.f32 1.5, %v53_v33 }
  0x99   :  { %120 = vrcp.f32 %v62_v34  ;;  %v55_v36 = vmul.f32 %v119_v25, %v54_v35  ;;  %v75_v45 = vand.u32 2147483648, %v62_v34  ;;  %v73_v49 = vand.u32 2147483647, %v62_v34 }
  0x9a   :  { %vm69_vm5 = vweird.f32 %v62_v34 }
  0x9b   :  { %v56_v37 = vmul.f32 %v55_v36, %v37_v21  ;;  %v76_v51 = vor.u32 1.1754944e-38, %v75_v45  ;;  %vm74_vm7 = vcmp.eq.f32.partialorder %v73_v49, 8.507059e+37 }
  0x9d   :  { %v58_v39 = vsel %vm57_vm2, %v37_v21, %v56_v37 }
  0x9e   :  { %v61_v41 = vsel %vm59_vm3, %v60_v38, %v58_v39 }
  0x9f   :  { %v121_v40 = vpop.eup %120  ;;  %v63_v43 = vadd.f32 1e-06, %v61_v41 }
  0xa0   :  { %v65_v42 = vmul.f32 %v121_v40, %v62_v34  ;;  %vm70_vm4 = vweird.f32 %v121_v40 }
  0xa1   :  { %122 = vrcp.f32 %v63_v43  ;;  %vm71_vm6 = vmor %vm69_vm5, %vm70_vm4  ;;  %v89_v61 = vand.u32 2147483648, %v63_v43  ;;  %v87_v0 = vand.u32 2147483647, %v63_v43  ;;  %vm83_vm9 = vweird.f32 %v63_v43 }
  0xa2   :  { %v66_v44 = vsub.f32 1.0, %v65_v42 }
  0xa3   :  { %v90_v3 = vor.u32 1.1754944e-38, %v89_v61  ;;  %vm88_vm11 = vcmp.eq.f32.partialorder %v87_v0, 8.507059e+37 }
  0xa4   :  { %v67_v48 = vmul.f32 %v121_v40, %v66_v44 }
  0xa6   :  { %v68_v50 = vadd.f32 %v121_v40, %v67_v48 }
  0xa7   :  { %v123_v52 = vpop.eup %122 }
  0xa8   :  { %v72_v55 = vsel %vm71_vm6, %v121_v40, %v68_v50  ;;  %v79_v57 = vmul.f32 %v123_v52, %v63_v43  ;;  %vm84_vm8 = vweird.f32 %v123_v52 }
  0xa9   :  { %v77_v56 = vsel %vm74_vm7, %v76_v51, %v72_v55  ;;  %vm85_vm10 = vmor %vm83_vm9, %vm84_vm8 }
  0xaa   :  { %v100_v58 = vmul.f32 %v98_v53, %v77_v56  ;;  %v80_v59 = vsub.f32 1.0, %v79_v57 }
  0xac   :  { %v106_v60 = vadd.f32 %v115_v54, %v100_v58  ;;  %v81_v63 = vmul.f32 %v123_v52, %v80_v59 }
  0xae   :  { %108 = vst [vmem:[%s182_s3] sm:$0xff] %v106_v60  ;;  %v82_v1 = vadd.f32 %v123_v52, %v81_v63 }
  0xb0   :  { %v86_v5 = vsel %vm85_vm10, %v123_v52, %v82_v1 }
  0xb1   :  { %v91_v6 = vsel %vm88_vm11, %v90_v3, %v86_v5 }
  0xb2   :  { %v101_v7 = vmul.f32 %v99_v4, %v91_v6 }
  0xb4   :  { %v107_v8 = vadd.f32 %v115_v54, %v101_v7 }
  0xb6   :  { %109 = vst [vmem:[%s182_s3 + $0x8] sm:$0xff] %v107_v8 }

</bundles_post_ra>
